<compile_context>
chip_gen: v7x
topology: tpu7x:2x2x1
jax: 0.10.0
libtpu: 0.0.40
codegen_flags: <defaults>
</compile_context>

<pallas_src>
import jax
import jax.numpy as jnp
from jax.experimental import pallas as pl
from jax.experimental.pallas import tpu as pltpu


_LANE = 128
_SUBLANE = 8
_DEFAULT_MAX_TILE_BYTES = 2 * 1024 * 1024   # per-operand per-grid-step budget
_VMEM_LIMIT_BYTES = 32 * 1024 * 1024        # safe scoped limit on v5e/v6e/v7x
_SMALL_N_FALLBACK = 2048                    # below this, plain XLA beats launch cost


def _round_up(n, m):
    return ((n + m - 1) // m) * m


def _cdiv(a, b):
    return -(-a // b)


# ----------------------------- kernels ------------------------------------
# Layout inside the kernel (lane-dense planes):
#   x_ref, w_ref, o_ref : (D, tile_r, 128)   -- point axis packed as rows x lanes
#   m_ref               : (D, D)   in SMEM
#   t_ref               : (1, D)   in SMEM
# Padded lanes/rows hold zeros in x/w; in the 'a'/'v' paths they end up holding
# the bias t[d] -- harmless, the wrapper slices them off.


def _affine_v_kernel(x_ref, w_ref, m_ref, t_ref, o_ref):
    """out[d] = sum_k M[k, d] * x[k] + t[d] + w[d]            (Ttype == 'v')"""
    D = x_ref.shape[0]
    for d in range(D):                       # static unroll, D is tiny
        acc = x_ref[0] * m_ref[0, d]         # whole-plane VPU FMA, no MXU
        for k in range(1, D):
            acc = acc + x_ref[k] * m_ref[k, d]
        acc = acc + t_ref[0, d]              # scalar bias from SMEM
        acc = acc + w_ref[d]                 # per-point offset
        o_ref[d] = acc.astype(o_ref.dtype)   # one unmasked full-plane store


def _affine_a_kernel(x_ref, m_ref, t_ref, o_ref):
    """out[d] = sum_k M[k, d] * x[k] + t[d]                   (Ttype == 'a')"""
    D = x_ref.shape[0]
    for d in range(D):
        acc = x_ref[0] * m_ref[0, d]
        for k in range(1, D):
            acc = acc + x_ref[k] * m_ref[k, d]
        acc = acc + t_ref[0, d]
        o_ref[d] = acc.astype(o_ref.dtype)


def _offset_kernel(x_ref, w_ref, o_ref):
    """out = x + w                                            (Ttype == 'f')"""
    o_ref[...] = (x_ref[...] + w_ref[...]).astype(o_ref.dtype)


# ----------------------------- layout helpers ------------------------------


def _to_planes(a, n_pad):
    """(N, D) -> (D, n_pad // 128, 128), zero-padded, point axis on lanes."""
    N, D = a.shape
    planes = jnp.zeros((D, n_pad), a.dtype).at[:, :N].set(a.T)
    return planes.reshape(D, n_pad // _LANE, _LANE)


def _from_planes(planes, N):
    """(D, R, 128) -> (N, D)."""
    D = planes.shape[0]
    return planes.reshape(D, -1)[:, :N].T


# ----------------------------- wrapper --------------------------------------


class Transform:
    """JAX/Pallas port of the PyTorch Transform module."""

    def __init__(self, indim=2, pointnum=100, Ttype="v",
                 force_kernel=False, max_tile_bytes=_DEFAULT_MAX_TILE_BYTES):
        self.Ttype = Ttype
        self.indim = indim
        self.pointnum = pointnum
        self.force_kernel = force_kernel
        self.max_tile_bytes = max_tile_bytes
        # PyTorch inits: w = zeros, affineM = eye, affinet = zeros.
        if Ttype == "f":
            self.w = jnp.zeros((pointnum, indim), jnp.float32)
        elif Ttype in ("a", "v"):
            self.affineM = jnp.eye(indim, dtype=jnp.float32)
            self.affinet = jnp.zeros((1, indim), jnp.float32)
            if Ttype == "v":
                self.w = jnp.zeros((pointnum, indim), jnp.float32)
        else:
            raise NotImplementedError
        # Lazy cache for the lane-dense, padded copy of the w parameter.
        self._w_src = None
        self._w_npad = None
        self._w_planes = None

    # -------- tiling plan -----------------------------------------------
    def _plan(self, N, D, itemsize):
        """Pick (n_pad, R, tile_r, grid) for the lane-dense plane layout."""
        row_bytes = D * _LANE * itemsize
        max_rows = max(_SUBLANE,
                       (self.max_tile_bytes // row_bytes) // _SUBLANE * _SUBLANE)
        r0 = _round_up(N, _LANE) // _LANE          # rows after 128-lane padding
        g = max(1, _cdiv(r0, max_rows))
        if g == 1:
            tile_r, rows = r0, r0                  # whole array = one block (allowed)
        else:
            tile_r = _round_up(_cdiv(r0, g), _SUBLANE)   # multiple of 8
            rows = g * tile_r                      # waste <= g * 8 rows
        return rows * _LANE, rows, tile_r, (g,)

    def _w_planes_cached(self, n_pad, dtype):
        if (self._w_src is not self.w) or (self._w_npad != n_pad):
            self._w_planes = _to_planes(self.w.astype(dtype), n_pad)
            self._w_src = self.w
            self._w_npad = n_pad
        return self._w_planes

    # -------- forward ------------------------------------------------------
    def __call__(self, x):
        N, D = x.shape
        assert (N, D) == (self.pointnum, self.indim)

        # Tiny point clouds: custom-call launch overhead >> data movement.
        if not self.force_kernel and N < _SMALL_N_FALLBACK:
            if self.Ttype == "f":
                return x + self.w
            out = x @ self.affineM + self.affinet
            return out + self.w if self.Ttype == "v" else out

        itemsize = jnp.dtype(x.dtype).itemsize
        n_pad, rows, tile_r, grid = self._plan(N, D, itemsize)

        x_planes = _to_planes(x, n_pad)

        vspec = pl.BlockSpec((D, tile_r, _LANE), lambda i: (0, i, 0))
        sspec = pl.BlockSpec(memory_space=pltpu.MemorySpace.SMEM)
        out_shape = jax.ShapeDtypeStruct((D, rows, _LANE), x.dtype)
        cparams = pltpu.CompilerParams(
            dimension_semantics=("parallel",),     # shards across v7x's 2 TCs
            vmem_limit_bytes=_VMEM_LIMIT_BYTES,
        )
        pad_bytes = n_pad * D * itemsize           # actual padded traffic / array

        if self.Ttype == "f":
            out_planes = pl.pallas_call(
                _offset_kernel,
                out_shape=out_shape,
                grid=grid,
                in_specs=[vspec, vspec],
                out_specs=vspec,
                compiler_params=cparams,
                cost_estimate=pl.CostEstimate(
                    flops=n_pad * D, transcendentals=0,
                    bytes_accessed=3 * pad_bytes),
            )(x_planes, self._w_planes_cached(n_pad, x.dtype))
        elif self.Ttype == "a":
            out_planes = pl.pallas_call(
                _affine_a_kernel,
                out_shape=out_shape,
                grid=grid,
                in_specs=[vspec, sspec, sspec],
                out_specs=vspec,
                compiler_params=cparams,
                cost_estimate=pl.CostEstimate(
                    flops=2 * n_pad * D * D + n_pad * D, transcendentals=0,
                    bytes_accessed=2 * pad_bytes),
            )(x_planes, self.affineM, self.affinet)
        else:  # Ttype == 'v'
            out_planes = pl.pallas_call(
                _affine_v_kernel,
                out_shape=out_shape,
                grid=grid,
                in_specs=[vspec, vspec, sspec, sspec],
                out_specs=vspec,
                compiler_params=cparams,
                cost_estimate=pl.CostEstimate(
                    flops=2 * n_pad * D * D + 2 * n_pad * D, transcendentals=0,
                    bytes_accessed=3 * pad_bytes),
            )(x_planes, self._w_planes_cached(n_pad, x.dtype),
              self.affineM, self.affinet)

        # Back to the module's (pointnum, indim) contract.
        return _from_planes(out_planes, N)


# ----------------------------- test ----------------------------------------


if __name__ == "__main__":
    key = jax.random.PRNGKey(0)
    kx, km, kt, kw, kx2, kw2 = jax.random.split(key, 6)

    # --- default module size: pointnum=100, indim=2 -------------------------
    pointnum, indim = 100, 2
    x = jax.random.normal(kx, (pointnum, indim), jnp.float32)
    M = jax.random.normal(km, (indim, indim), jnp.float32)
    t = jax.random.normal(kt, (1, indim), jnp.float32)
    w = jax.random.normal(kw, (pointnum, indim), jnp.float32)

    # 'v' through the Pallas kernel (forced; default would take the XLA path)
    model_v = Transform(indim, pointnum, "v", force_kernel=True)
    model_v.affineM, model_v.affinet, model_v.w = M, t, w
    out_v = jax.block_until_ready(model_v(x))
    ref_v = x @ M + t + w
    assert out_v.shape == (pointnum, indim)
    assert jnp.allclose(out_v, ref_v, atol=1e-5, rtol=1e-5), "Ttype='v' mismatch"

    # 'a' path
    model_a = Transform(indim, pointnum, "a", force_kernel=True)
    model_a.affineM, model_a.affinet = M, t
    out_a = jax.block_until_ready(model_a(x))
    assert jnp.allclose(out_a, x @ M + t, atol=1e-5, rtol=1e-5), "Ttype='a' mismatch"

    # 'f' path
    model_f = Transform(indim, pointnum, "f", force_kernel=True)
    model_f.w = w
    out_f = jax.block_until_ready(model_f(x))
    assert jnp.allclose(out_f, x + w, atol=1e-5, rtol=1e-5), "Ttype='f' mismatch"

    # small-N fallback path (pure XLA, launch-overhead avoidance)
    model_fb = Transform(indim, pointnum, "v")
    model_fb.affineM, model_fb.affinet, model_fb.w = M, t, w
    out_fb = jax.block_until_ready(model_fb(x))
    assert jnp.allclose(out_fb, ref_v, atol=1e-5, rtol=1e-5), "fallback mismatch"

    # --- larger pointnum: exercises row padding + multi-step 'parallel' grid -
    big_n = 5000  # rows=40 after 128-lane pad; tiny tile budget forces grid=(3,)
    x_big = jax.random.normal(kx2, (big_n, indim), jnp.float32)
    w_big = jax.random.normal(kw2, (big_n, indim), jnp.float32)
    model_big = Transform(indim, big_n, "v", force_kernel=True,
                          max_tile_bytes=16 * 1024)
    model_big.affineM, model_big.affinet, model_big.w = M, t, w_big
    out_big = jax.block_until_ready(model_big(x_big))
    ref_big = x_big @ M + t + w_big
    assert jnp.allclose(out_big, ref_big, atol=1e-5, rtol=1e-5), "big-N mismatch"
    # second call reuses the cached lane-dense w (no per-call param relayout)
    out_big2 = jax.block_until_ready(model_big(x_big))
    assert jnp.allclose(out_big2, ref_big, atol=1e-5, rtol=1e-5), "cache mismatch"

    print("KERNEL_OK")
</pallas_src>

<mosaic_0001>
module attributes {stable_mosaic.version = 11 : i64} {
  func.func @_affine_v_kernel(%arg0: i32, %arg1: memref<2x1x128xf32, #tpu.memory_space<vmem>>, %arg2: memref<2x1x128xf32, #tpu.memory_space<vmem>>, %arg3: memref<2x2xf32, #tpu.memory_space<smem>>, %arg4: memref<1x2xf32, #tpu.memory_space<smem>>, %arg5: memref<2x1x128xf32, #tpu.memory_space<vmem>>) attributes {dimension_semantics = [#tpu.dimension_semantics<parallel>], iteration_bounds = array<i64: 1>, scalar_prefetch = 0 : i64, scratch_operands = 0 : i64, tpu.core_type = #tpu.core_type<tc>, window_params = [{transform_indices = @transform_0, window_bounds = array<i64: 2, 1, 128>}, {transform_indices = @transform_1, window_bounds = array<i64: 2, 1, 128>}, {transform_indices = @transform_2, window_bounds = array<i64: 2, 2>}, {transform_indices = @transform_3, window_bounds = array<i64: 1, 2>}, {transform_indices = @transform_4, window_bounds = array<i64: 2, 1, 128>}]} {
    %c0 = arith.constant 0 : index
    %c0_0 = arith.constant 0 : index
    %c0_1 = arith.constant 0 : index
    %0 = vector.load %arg1[%c0, %c0_0, %c0_1] : memref<2x1x128xf32, #tpu.memory_space<vmem>>, vector<1x1x128xf32>
    %1 = vector.shape_cast %0 : vector<1x1x128xf32> to vector<1x128xf32>
    %c0_2 = arith.constant 0 : index
    %c0_3 = arith.constant 0 : index
    %2 = memref.load %arg3[%c0_2, %c0_3] : memref<2x2xf32, #tpu.memory_space<smem>>
    %3 = vector.broadcast %2 : f32 to vector<1x128xf32>
    %4 = arith.mulf %1, %3 : vector<1x128xf32>
    %c1 = arith.constant 1 : index
    %c0_4 = arith.constant 0 : index
    %c0_5 = arith.constant 0 : index
    %5 = vector.load %arg1[%c1, %c0_4, %c0_5] : memref<2x1x128xf32, #tpu.memory_space<vmem>>, vector<1x1x128xf32>
    %6 = vector.shape_cast %5 : vector<1x1x128xf32> to vector<1x128xf32>
    %c1_6 = arith.constant 1 : index
    %c0_7 = arith.constant 0 : index
    %7 = memref.load %arg3[%c1_6, %c0_7] : memref<2x2xf32, #tpu.memory_space<smem>>
    %8 = vector.broadcast %7 : f32 to vector<1x128xf32>
    %9 = arith.mulf %6, %8 : vector<1x128xf32>
    %10 = arith.addf %4, %9 : vector<1x128xf32>
    %c0_8 = arith.constant 0 : index
    %c0_9 = arith.constant 0 : index
    %11 = memref.load %arg4[%c0_8, %c0_9] : memref<1x2xf32, #tpu.memory_space<smem>>
    %12 = vector.broadcast %11 : f32 to vector<1x128xf32>
    %13 = arith.addf %10, %12 : vector<1x128xf32>
    %c0_10 = arith.constant 0 : index
    %c0_11 = arith.constant 0 : index
    %c0_12 = arith.constant 0 : index
    %14 = vector.load %arg2[%c0_10, %c0_11, %c0_12] : memref<2x1x128xf32, #tpu.memory_space<vmem>>, vector<1x1x128xf32>
    %15 = vector.shape_cast %14 : vector<1x1x128xf32> to vector<1x128xf32>
    %16 = arith.addf %13, %15 : vector<1x128xf32>
    %c0_13 = arith.constant 0 : index
    %c0_14 = arith.constant 0 : index
    %c0_15 = arith.constant 0 : index
    %17 = vector.load %arg5[%c0_13, %c0_14, %c0_15] : memref<2x1x128xf32, #tpu.memory_space<vmem>>, vector<1x1x128xf32>
    %18 = vector.shape_cast %17 : vector<1x1x128xf32> to vector<1x128xf32>
    %19 = vector.shape_cast %16 : vector<1x128xf32> to vector<1x1x128xf32>
    tpu.vector_store %arg5[%c0_13, %c0_14, %c0_15], %19 {strides = array<i32>} : memref<2x1x128xf32, #tpu.memory_space<vmem>>, vector<1x1x128xf32>,
    %c0_16 = arith.constant 0 : index
    %c0_17 = arith.constant 0 : index
    %c0_18 = arith.constant 0 : index
    %20 = vector.load %arg1[%c0_16, %c0_17, %c0_18] : memref<2x1x128xf32, #tpu.memory_space<vmem>>, vector<1x1x128xf32>
    %21 = vector.shape_cast %20 : vector<1x1x128xf32> to vector<1x128xf32>
    %c0_19 = arith.constant 0 : index
    %c1_20 = arith.constant 1 : index
    %22 = memref.load %arg3[%c0_19, %c1_20] : memref<2x2xf32, #tpu.memory_space<smem>>
    %23 = vector.broadcast %22 : f32 to vector<1x128xf32>
    %24 = arith.mulf %21, %23 : vector<1x128xf32>
    %c1_21 = arith.constant 1 : index
    %c0_22 = arith.constant 0 : index
    %c0_23 = arith.constant 0 : index
    %25 = vector.load %arg1[%c1_21, %c0_22, %c0_23] : memref<2x1x128xf32, #tpu.memory_space<vmem>>, vector<1x1x128xf32>
    %26 = vector.shape_cast %25 : vector<1x1x128xf32> to vector<1x128xf32>
    %c1_24 = arith.constant 1 : index
    %c1_25 = arith.constant 1 : index
    %27 = memref.load %arg3[%c1_24, %c1_25] : memref<2x2xf32, #tpu.memory_space<smem>>
    %28 = vector.broadcast %27 : f32 to vector<1x128xf32>
    %29 = arith.mulf %26, %28 : vector<1x128xf32>
    %30 = arith.addf %24, %29 : vector<1x128xf32>
    %c0_26 = arith.constant 0 : index
    %c1_27 = arith.constant 1 : index
    %31 = memref.load %arg4[%c0_26, %c1_27] : memref<1x2xf32, #tpu.memory_space<smem>>
    %32 = vector.broadcast %31 : f32 to vector<1x128xf32>
    %33 = arith.addf %30, %32 : vector<1x128xf32>
    %c1_28 = arith.constant 1 : index
    %c0_29 = arith.constant 0 : index
    %c0_30 = arith.constant 0 : index
    %34 = vector.load %arg2[%c1_28, %c0_29, %c0_30] : memref<2x1x128xf32, #tpu.memory_space<vmem>>, vector<1x1x128xf32>
    %35 = vector.shape_cast %34 : vector<1x1x128xf32> to vector<1x128xf32>
    %36 = arith.addf %33, %35 : vector<1x128xf32>
    %c1_31 = arith.constant 1 : index
    %c0_32 = arith.constant 0 : index
    %c0_33 = arith.constant 0 : index
    %37 = vector.load %arg5[%c1_31, %c0_32, %c0_33] : memref<2x1x128xf32, #tpu.memory_space<vmem>>, vector<1x1x128xf32>
    %38 = vector.shape_cast %37 : vector<1x1x128xf32> to vector<1x128xf32>
    %39 = vector.shape_cast %36 : vector<1x128xf32> to vector<1x1x128xf32>
    tpu.vector_store %arg5[%c1_31, %c0_32, %c0_33], %39 {strides = array<i32>} : memref<2x1x128xf32, #tpu.memory_space<vmem>>, vector<1x1x128xf32>,
    return
  }
  func.func @transform_0(%arg0: i32) -> (i32, i32, i32) {
    %c0_i32 = arith.constant 0 : i32
    %c0_i32_0 = arith.constant 0 : i32
    %c0_i32_1 = arith.constant 0 : i32
    return %c0_i32, %arg0, %c0_i32_0 : i32, i32, i32
  }
  func.func @transform_1(%arg0: i32) -> (i32, i32, i32) {
    %c0_i32 = arith.constant 0 : i32
    %c0_i32_0 = arith.constant 0 : i32
    %c0_i32_1 = arith.constant 0 : i32
    return %c0_i32, %arg0, %c0_i32_0 : i32, i32, i32
  }
  func.func @transform_2(%arg0: i32) -> (i32, i32) {
    %c0_i32 = arith.constant 0 : i32
    %c0_i32_0 = arith.constant 0 : i32
    %c0_i32_1 = arith.constant 0 : i32
    return %c0_i32, %c0_i32_0 : i32, i32
  }
  func.func @transform_3(%arg0: i32) -> (i32, i32) {
    %c0_i32 = arith.constant 0 : i32
    %c0_i32_0 = arith.constant 0 : i32
    %c0_i32_1 = arith.constant 0 : i32
    return %c0_i32, %c0_i32_0 : i32, i32
  }
  func.func @transform_4(%arg0: i32) -> (i32, i32, i32) {
    %c0_i32 = arith.constant 0 : i32
    %c0_i32_0 = arith.constant 0 : i32
    %c0_i32_1 = arith.constant 0 : i32
    return %c0_i32, %arg0, %c0_i32_0 : i32, i32, i32
  }
}

</mosaic_0001>

<bundles_post_ra>
// kernel: tpu_custom_call.1
= control target key start
LH: loop header
LB: loop body
LE: loop exit
PB: predicated region body
PF: predicated region fallthrough
CT: control target
= control target key end

     0   :  { %9 = vsyncpa [#allocation3], 0  ;;  %s269_s0 = inlined_call_operand.hbm [shape: f32[2,1,128], index: 0, kind: input, shape index: {}]   ;;  %s270_s1 = inlined_call_operand.vmem [shape: f32[2,1,128], index: 1, kind: input, shape index: {}]   ;;  %s271_s2 = inlined_call_operand.vmem [shape: f32[2,2], index: 2, kind: input, shape index: {}]   ;;  %s272_s3 = inlined_call_operand.vmem [shape: f32[1,2], index: 3, kind: input, shape index: {}]   ;;  %s273_s4 = inlined_call_operand.hbm [shape: f32[2,1,128], index: 4, kind: output, shape index: {}]  }
   0x1   :  { %10 = vsyncpa [#allocation5], 0 }
   0x2   :  { %11 = vsyncpa [#allocation8], 0 }
   0x3   :  { %12 = vsyncpa [#allocation4], 0  ;;  %s196_s15 = smov [#allocation2]   ;;  %s33_s19 = sshll.u32 %s271_s2, 4  ;;  %s34_s19 = int_to_ptr.vmem [resolvable:$true] %s33_s19 }
   0x4   :  { %s18_s16 = sshll.u32 %s196_s15, 4  ;;  %s120_s22 = scalar_lea.hbm %s269_s0, 32  ;;  %s19_s16 = int_to_ptr.vmem [resolvable:$true] %s18_s16 }
   0x5   :  { %p121_p0 = scmp.ne.s32.totalorder %s269_s0, %s120_s22  ;;  %p124_p1 = scmp.lt.u32.totalorder %s120_s22, %s269_s0 }
   0x7   :  { %p126_p2 = pnand %p124_p1, %p121_p0 }
   0x9   :  { %129 = shalt.err (!%p126_p2)
}
   0xa   :  { %s130_s27 = scalar_lea.vmem %s19_s16, 32  ;;  %p135_p4 = scmp.lt.s32.totalorder %s19_s16, %s19_s16 }
   0xb   :  { %p131_p3 = scmp.ne.s32.totalorder %s19_s16, %s130_s27  ;;  %p136_p5 = scmp.lt.s32.totalorder %s130_s27, %s130_s27 }
   0xd   :  { %p137_p6 = por %p136_p5, %p135_p4 }
   0xf   :  { %p138_p7 = pnand %p137_p6, %p131_p3 }
  0x11   :  { %141 = shalt.err (!%p138_p7)
}
  0x12   :  { %s197_s2 = smov 16   ;;  %s198_s28 = smov 1  }
  0x13   :  { %24 = dma.hbm_to_vmem [thread:$0]  %s269_s0, 32, %s19_s16, [#allocation3], %s197_s2, %s197_s2, %s198_s28  }
  0x14   :  { %s142_s5 = scalar_lea.vmem %s34_s19, 32  ;;  %p147_p9 = scmp.lt.s32.totalorder %s34_s19, %s34_s19 }
  0x15   :  { %p143_p8 = scmp.ne.s32.totalorder %s34_s19, %s142_s5  ;;  %p148_p10 = scmp.lt.s32.totalorder %s142_s5, %s142_s5 }
  0x17   :  { %p149_p11 = por %p148_p10, %p147_p9 }
  0x19   :  { %p150_p12 = pnand %p149_p11, %p143_p8 }
  0x1b   :  { %153 = shalt.err (!%p150_p12)
}
  0x1c   :  { %s199_s6 = smov [#allocation6]   ;;  %s43_s9 = sshll.u32 %s272_s3, 4  ;;  %s44_s9 = int_to_ptr.vmem [resolvable:$true] %s43_s9 }
  0x1d   :  { %36 = dma.vmem_to_smem %s34_s19, 32, %s199_s6, [#allocation5]  }
  0x1e   :  { %s154_s10 = scalar_lea.vmem %s44_s9, 16  ;;  %p159_p0 = scmp.lt.s32.totalorder %s44_s9, %s44_s9 }
  0x1f   :  { %p155_p13 = scmp.ne.s32.totalorder %s44_s9, %s154_s10  ;;  %p160_p1 = scmp.lt.s32.totalorder %s154_s10, %s154_s10 }
  0x21   :  { %p161_p2 = por %p160_p1, %p159_p0 }
  0x23   :  { %p162_p3 = pnand %p161_p2, %p155_p13 }
  0x25   :  { %165 = shalt.err (!%p162_p3)
}
  0x26   :  { %s200_s0 = smov [#allocation7]  }
  0x27   :  { %46 = dma.vmem_to_smem %s44_s9, 16, %s200_s0, [#allocation8]  }
  0x28   :  { %188 = dma.done.wait [#allocation3], 32  }
  0x29   :  { %189 = vsyncadd [#allocation3], 4294967264 }
  0x2a   :  { %190 = dma.done.wait [#allocation5], 32  }
  0x2b   :  { %191 = vsyncadd [#allocation5], 4294967264 }
  0x2c   :  { %192 = dma.done.wait [#allocation8], 16  }
  0x2d   :  { %193 = vsyncadd [#allocation8], 4294967280 }
  0x2e   :  { %56 = sfence }
  0x2f   :  { %s58_s11 = sld [smem:[#allocation6]]  ;;  %s110_s13 = sld [smem:[#allocation6 + $0x1]]  ;;  %v57_v0 = vld [vmem:[#allocation2] sm:$0x1]  ;;  %v62_v1 = vld [vmem:[#allocation2 + $0x1] sm:$0x1] }
  0x30   :  { %s109_s12 = sld [smem:[#allocation6 + $0x80]]  ;;  %s111_s14 = sld [smem:[#allocation6 + $0x81]]  ;;  %v73_v3 = vld [vmem:[#allocation2] sm:$0x1]  ;;  %v77_v6 = vld [vmem:[#allocation2 + $0x1] sm:$0x1] }
  0x31   :  { %s67_s3 = sld [smem:[#allocation7]]  ;;  %s112_s15 = sld [smem:[#allocation7 + $0x1]]  ;;  %v70_v14 = vld [vmem:[%s270_s1] sm:$0x1]  ;;  %v113_v18 = vld [vmem:[%s270_s1 + $0x1] sm:$0x1] }
  0x32   :  { %s201_s20 = smov [#allocation9]  }
  0x33   :  { %s95_s21 = sshll.u32 %s201_s20, 4  ;;  %s96_s21 = int_to_ptr.vmem [resolvable:$true] %s95_s21 }
  0x34   :  { %s166_s22 = scalar_lea.vmem %s96_s21, 32  ;;  %p171_p5 = scmp.lt.s32.totalorder %s96_s21, %s96_s21 }
  0x35   :  { %v59_v2 = vstv %s58_s11  ;;  %v75_v8 = vstv %s110_s13  ;;  %p167_p4 = scmp.ne.s32.totalorder %s96_s21, %s166_s22  ;;  %p172_p6 = scmp.lt.s32.totalorder %s166_s22, %s166_s22 }
  0x36   :  { %v60_v4 = vmul.f32 %v59_v2, %v57_v0  ;;  %v64_v5 = vstv %s109_s12  ;;  %v76_v10 = vmul.f32 %v75_v8, %v73_v3  ;;  %v79_v11 = vstv %s111_s14 }
  0x37   :  { %v65_v7 = vmul.f32 %v64_v5, %v62_v1  ;;  %v68_v9 = vstv %s67_s3  ;;  %v80_v13 = vmul.f32 %v79_v11, %v77_v6  ;;  %v83_v15 = vstv %s112_s15  ;;  %p173_p7 = por %p172_p6, %p171_p5 }
  0x39   :  { %v66_v12 = vadd.f32 %v65_v7, %v60_v4  ;;  %v81_v17 = vadd.f32 %v80_v13, %v76_v10  ;;  %p174_p8 = pnand %p173_p7, %p167_p4 }
  0x3b   :  { %v69_v16 = vadd.f32 %v68_v9, %v66_v12  ;;  %v84_v20 = vadd.f32 %v83_v15, %v81_v17 }
  0x3d   :  { %v71_v19 = vadd.f32 %v70_v14, %v69_v16  ;;  %v87_v21 = vadd.f32 %v113_v18, %v84_v20 }
  0x3f   :  { %72 = vst [vmem:[#allocation9] sm:$0x1] %v71_v19  ;;  %89 = vst [vmem:[#allocation9 + $0x1] sm:$0x1] %v87_v21 }
  0x40   :  { %177 = shalt.err (!%p174_p8)
}
  0x41   :  { %s178_s25 = scalar_lea.hbm %s273_s4, 32 }
  0x42   :  { %p179_p9 = scmp.ne.s32.totalorder %s273_s4, %s178_s25  ;;  %p182_p10 = scmp.lt.u32.totalorder %s178_s25, %s273_s4 }
  0x44   :  { %p184_p11 = pnand %p182_p10, %p179_p9 }
  0x46   :  { %187 = shalt.err (!%p184_p11)
}
  0x47   :  { %101 = dma.vmem_to_hbm [thread:$0]  %s96_s21, 32, %s273_s4, [#allocation4], %s197_s2, %s197_s2, %s198_s28  }
  0x48   :  { %194 = dma.done.wait [#allocation4], 32  }
  0x49   :  { %195 = vsyncadd [#allocation4], 4294967264 }
  0x4a   :  { %105 = vsyncpa [#allocation3], 1 }
  0x4b   :  { %106 = vsyncpa [#allocation4], 1 }
  0x4c   :  { %107 = vsyncpa [#allocation5], 1 }
  0x4d   :  { %108 = vsyncpa [#allocation8], 1 }

</bundles_post_ra>
